<compile_context>
chip_gen: v6e
topology: v6e:2x2x1
jax: 0.10.0
libtpu: 0.0.40
codegen_flags: <defaults>
</compile_context>

<pallas_src>
import functools

import jax
import jax.numpy as jnp
from jax import lax
from jax.experimental import pallas as pl
from jax.experimental.pallas import tpu as pltpu


_LANES = 128
_SUBLANES = 8
_TARGET_TILE_ROWS = 2048     # 2048 rows x 128 lanes = 262144 points / grid step


def _round_up(x, m):
    return ((x + m - 1) // m) * m


# --------------------------------------------------------------------------
# Pallas kernel: per-point voxel quantization -> flat voxel id (or sentinel)
# --------------------------------------------------------------------------
def _make_quantize_kernel(x_min, y_min, z_min, vx, vy, vz, gx, gy, gz, sentinel):
    def kernel(c_ref, flat_ref):
        # c_ref block: (1, 3, tile_rows, 128) f32  (x / y / z planes)
        x = c_ref[0, 0]
        y = c_ref[0, 1]
        z = c_ref[0, 2]
        # Division matches the reference formula; this kernel is HBM-bound so
        # the extra VPU/EUP work is free-slot filler.
        fx = jnp.floor((x - x_min) / vx)
        fy = jnp.floor((y - y_min) / vy)
        fz = jnp.floor((z - z_min) / vz)
        valid = ((fx >= 0.0) & (fx < gx) &
                 (fy >= 0.0) & (fy < gy) &
                 (fz >= 0.0) & (fz < gz))
        # Clamp before the float->int cast so far-out padded points can never
        # hit implementation-defined int32 conversion.
        cx = jnp.clip(fx, -1.0, float(gx)).astype(jnp.int32)
        cy = jnp.clip(fy, -1.0, float(gy)).astype(jnp.int32)
        cz = jnp.clip(fz, -1.0, float(gz)).astype(jnp.int32)
        flat = cz * (gx * gy) + cy * gx + cx
        flat_ref[0] = jnp.where(valid, flat, jnp.int32(sentinel))

    return kernel


def _voxel_quantize_pallas(coords4, pc_range, voxel_size, grid_size, tile_rows):
    """coords4: (B, 3, R, 128) f32 -> (B, R, 128) i32 flat-voxel-id-or-sentinel."""
    B, _, R, _ = coords4.shape
    gx, gy, gz = grid_size
    sentinel = gx * gy * gz
    tile_rows = min(tile_rows, R)

    kernel = _make_quantize_kernel(
        pc_range[0], pc_range[1], pc_range[2],
        voxel_size[0], voxel_size[1], voxel_size[2],
        gx, gy, gz, sentinel)

    in_spec = pl.BlockSpec((1, 3, tile_rows, _LANES), lambda b, i: (b, 0, i, 0))
    out_spec = pl.BlockSpec((1, tile_rows, _LANES), lambda b, i: (b, i, 0))
    return pl.pallas_call(
        kernel,
        out_shape=jax.ShapeDtypeStruct((B, R, _LANES), jnp.int32),
        grid=(B, pl.cdiv(R, tile_rows)),
        in_specs=[in_spec],
        out_specs=out_spec,
        compiler_params=pltpu.CompilerParams(
            dimension_semantics=("parallel", "parallel"),
            vmem_limit_bytes=32 * 1024 * 1024),
    )(coords4)


# --------------------------------------------------------------------------
# First-come-first-served voxel scatter for a single sample (plain JAX,
# batched via vmap).  Data-dependent unique/scatter has no clean static
# Pallas equivalent, so it stays here.
# TODO(synk): if this sort/scatter path dominates end-to-end, move the FCFS
# bucketing into a Pallas scalar-prefetch/SMEM kernel.
# --------------------------------------------------------------------------
def _fcfs_scatter(flat, pts_pad, *, grid_size, max_points, max_voxels, sentinel):
    n_pad, c = pts_pad.shape
    gx, gy, gz = grid_size
    valid = flat != sentinel

    # Single stable sort carrying the index payload (key + payload in one op).
    idxs = jnp.arange(n_pad, dtype=jnp.int32)
    f_sorted, order = lax.sort((flat, idxs), dimension=0, is_stable=True,
                               num_keys=1)
    is_new = jnp.concatenate([jnp.ones((1,), bool), f_sorted[1:] != f_sorted[:-1]])
    group_start = lax.cummax(jnp.where(is_new, idxs, 0), axis=0)
    occ_sorted = idxs - group_start                      # slot within voxel
    first_orig_sorted = order[group_start].astype(jnp.int32)

    occ = jnp.zeros((n_pad,), jnp.int32).at[order].set(occ_sorted)
    first_pt = jnp.zeros((n_pad,), jnp.int32).at[order].set(first_orig_sorted)

    # Voxel rank = first-come order of its first point (CUDA hard-voxelize).
    is_first = (occ == 0) & valid
    prefix = jnp.cumsum(is_first.astype(jnp.int32))
    slot = prefix[first_pt] - 1

    kept = valid & (slot < max_voxels) & (occ < max_points)
    scat_slot = jnp.where(kept, slot, max_voxels)        # OOB index -> dropped
    scat_occ = jnp.where(kept, occ, 0)

    voxels = jnp.zeros((max_voxels, max_points, c), pts_pad.dtype)
    voxels = voxels.at[scat_slot, scat_occ].set(pts_pad, mode="drop")

    num_points = jnp.zeros((max_voxels,), jnp.int32)
    num_points = num_points.at[scat_slot].add(kept.astype(jnp.int32), mode="drop")

    # Scatter the flat ids of kept first-points, then decode only max_voxels
    # entries (cheap) instead of carrying cz/cy/cx for every point.
    first_slot = jnp.where(is_first & kept, slot, max_voxels)
    vox_flat = jnp.full((max_voxels,), sentinel, jnp.int32)
    vox_flat = vox_flat.at[first_slot].set(flat, mode="drop")

    cz = vox_flat // (gx * gy)
    rem = vox_flat - cz * (gx * gy)
    cy = rem // gx
    cx = rem - cy * gx
    coors = jnp.stack([cz, cy, cx], axis=1)              # (z, y, x) order
    coors = jnp.where((vox_flat == sentinel)[:, None], -1, coors)

    return voxels, coors, num_points


# --------------------------------------------------------------------------
# Batched hard voxelization (single jit; Pallas kernel + vmapped scatter)
# --------------------------------------------------------------------------
@functools.partial(
    jax.jit,
    static_argnames=("pc_range", "voxel_size", "grid_size",
                     "max_points", "max_voxels", "tile_rows"))
def _batched_hard_voxelize(coords_cm, points_b, *, pc_range, voxel_size,
                           grid_size, max_points, max_voxels, tile_rows):
    B, _, n_pad = coords_cm.shape
    R = n_pad // _LANES

    coords4 = coords_cm.reshape(B, 3, R, _LANES)
    flat2d = _voxel_quantize_pallas(coords4, pc_range, voxel_size, grid_size,
                                    tile_rows)
    flat = flat2d.reshape(B, n_pad)

    gx, gy, gz = grid_size
    scatter = functools.partial(
        _fcfs_scatter, grid_size=grid_size, max_points=max_points,
        max_voxels=max_voxels, sentinel=gx * gy * gz)
    return jax.vmap(scatter)(flat, points_b)


# --------------------------------------------------------------------------
# BatchVoxelization module (forward-pass semantics of the PyTorch module)
# --------------------------------------------------------------------------
class BatchVoxelization:
    def __init__(self, pc_range, voxel_size, max_voxels_num=20000,
                 max_points_in_voxel=30):
        self.pc_range = tuple(float(v) for v in pc_range)
        self.voxel_size = tuple(float(v) for v in voxel_size)
        self.max_points_in_voxel = int(max_points_in_voxel)
        if isinstance(max_voxels_num, tuple):
            self.max_voxels_num = max_voxels_num
        else:
            self.max_voxels_num = (max_voxels_num, max_voxels_num)
        self.training = False
        gx = int(round((self.pc_range[3] - self.pc_range[0]) / self.voxel_size[0]))
        gy = int(round((self.pc_range[4] - self.pc_range[1]) / self.voxel_size[1]))
        gz = int(round((self.pc_range[5] - self.pc_range[2]) / self.voxel_size[2]))
        self.grid_size = (gx, gy, gz)
        # flat voxel id is computed in int32; guard against silent overflow.
        assert gx * gy * gz < 2 ** 31 - 1, "voxel grid too large for int32 ids"

    def __call__(self, points_lst, is_deploy=False):
        max_voxels = (self.max_voxels_num[0] if self.training
                      else self.max_voxels_num[1])
        B = len(points_lst)
        C = points_lst[0].shape[1]

        # Pad rows only to a multiple of 8 sublanes (NOT to the tile size),
        # keeping the downstream sort/scatter length minimal.
        n_max = max(int(p.shape[0]) for p in points_lst)
        rows = _round_up(max(1, -(-n_max // _LANES)), _SUBLANES)
        n_pad = rows * _LANES

        # Pick the row tile: big (mem-bound kernel), but keep >= 2 parallel
        # grid steps when B == 1 so both v7x TensorCores get work.
        target_rows = _TARGET_TILE_ROWS
        if B == 1 and rows > _SUBLANES:
            target_rows = min(target_rows,
                              _round_up(-(-rows // 2), _SUBLANES))
        tile_rows = min(target_rows, rows)

        # Padding value lies strictly below every axis minimum -> padded
        # points always quantize to a negative cell index and are discarded.
        pad_val = float(min(self.pc_range[:3]) - 100.0)

        padded_pts = []
        padded_coords = []
        for p in points_lst:
            p = p.astype(jnp.float32)
            pad_n = n_pad - int(p.shape[0])
            padded_pts.append(jnp.pad(p, ((0, pad_n), (0, 0)),
                                      constant_values=pad_val))
            # Channel-major (3, n_pad) coordinate slab -> no in-jit
            # slice/transpose HBM round trip before the Pallas kernel.
            padded_coords.append(jnp.pad(p[:, :3].T, ((0, 0), (0, pad_n)),
                                         constant_values=pad_val))
        points_b = jnp.stack(padded_pts, axis=0)          # (B, n_pad, C)
        coords_cm = jnp.stack(padded_coords, axis=0)      # (B, 3, n_pad)

        voxels, coors, num_points = _batched_hard_voxelize(
            coords_cm, points_b,
            pc_range=self.pc_range, voxel_size=self.voxel_size,
            grid_size=self.grid_size, max_points=self.max_points_in_voxel,
            max_voxels=max_voxels, tile_rows=tile_rows)

        voxel_feature = voxels.reshape(B * max_voxels,
                                       self.max_points_in_voxel, C)
        num_points_per_voxel = num_points.reshape(B * max_voxels)

        batch_col = jnp.repeat(jnp.arange(B, dtype=coors.dtype),
                               max_voxels)[:, None]
        coors_batch = jnp.concatenate(
            [batch_col, coors.reshape(B * max_voxels, 3)], axis=1)
        # TODO(synk): PyTorch returns int64 coors (.long()); JAX x64 is disabled
        # by default so we return int32.
        return voxel_feature, coors_batch, num_points_per_voxel


# --------------------------------------------------------------------------
# Demo
# --------------------------------------------------------------------------
if __name__ == "__main__":
    key = jax.random.PRNGKey(0)

    pc_range = [0.0, -4.0, -2.0, 8.0, 4.0, 2.0]     # x/y/z min, x/y/z max
    voxel_size = [0.5, 0.5, 4.0]                    # -> grid (16, 16, 1)
    max_voxels = 64
    max_points = 8
    B, N, C = 2, 256, 4                             # 2 clouds, 256 pts, xyz+intensity

    points_lst = []
    for k in jax.random.split(key, B):
        xyz = jax.random.uniform(
            k, (N, 3),
            minval=jnp.array([-1.0, -5.0, -3.0]),   # partly outside pc_range
            maxval=jnp.array([9.0, 5.0, 3.0]))
        feat = jax.random.uniform(jax.random.fold_in(k, 1), (N, 1))
        points_lst.append(jnp.concatenate([xyz, feat], axis=1).astype(jnp.float32))

    voxelizer = BatchVoxelization(pc_range, voxel_size,
                                  max_voxels_num=max_voxels,
                                  max_points_in_voxel=max_points)

    voxel_feature, coors_batch, num_points = voxelizer(points_lst, is_deploy=True)
    (voxel_feature, coors_batch, num_points) = jax.block_until_ready(
        (voxel_feature, coors_batch, num_points))

    # Sanity checks on shapes and invariants.
    assert voxel_feature.shape == (B * max_voxels, max_points, C)
    assert coors_batch.shape == (B * max_voxels, 4)
    assert num_points.shape == (B * max_voxels,)
    assert int(num_points.max()) <= max_points
    gx, gy, gz = voxelizer.grid_size
    occupied = num_points > 0
    cz_o = coors_batch[:, 1][occupied]
    cy_o = coors_batch[:, 2][occupied]
    cx_o = coors_batch[:, 3][occupied]
    assert bool(jnp.all((cz_o >= 0) & (cz_o < gz)))
    assert bool(jnp.all((cy_o >= 0) & (cy_o < gy)))
    assert bool(jnp.all((cx_o >= 0) & (cx_o < gx)))
    assert bool(jnp.all(num_points[~occupied] == 0))
    assert bool(jnp.all(coors_batch[:, 1:][~occupied] == -1))
    print("KERNEL_OK")
</pallas_src>

<mosaic_0001>
module attributes {stable_mosaic.version = 11 : i64} {
  func.func private @main(%arg0: i32) attributes {dimension_semantics = [#tpu.dimension_semantics<core_parallel>], iteration_bounds = array<i64: 2>, tpu.core_type = #tpu.core_type<sc_scalar_subcore>, window_params = []} {
    return
  }
}

module attributes {stable_mosaic.version = 11 : i64} {
  func.func private @main(%arg0: i32) attributes {dimension_semantics = [#tpu.dimension_semantics<core_parallel>], iteration_bounds = array<i64: 2>, tpu.core_type = #tpu.core_type<sc_scalar_subcore>, window_params = []} {
    return
  }
}

module attributes {stable_mosaic.version = 11 : i64} {
  func.func @kernel(%arg0: i32, %arg1: i32, %arg2: memref<1x3x8x128xf32, #tpu.memory_space<vmem>>, %arg3: memref<1x8x128xi32, #tpu.memory_space<vmem>>) attributes {dimension_semantics = [#tpu.dimension_semantics<parallel>, #tpu.dimension_semantics<parallel>], iteration_bounds = array<i64: 2, 1>, scalar_prefetch = 0 : i64, scratch_operands = 0 : i64, tpu.core_type = #tpu.core_type<tc>, window_params = [{transform_indices = @transform_0, window_bounds = array<i64: 1, 3, 8, 128>}, {transform_indices = @transform_1, window_bounds = array<i64: 1, 8, 128>}]} {
    %c0 = arith.constant 0 : index
    %c0_0 = arith.constant 0 : index
    %c0_1 = arith.constant 0 : index
    %c0_2 = arith.constant 0 : index
    %0 = vector.load %arg2[%c0, %c0_0, %c0_1, %c0_2] : memref<1x3x8x128xf32, #tpu.memory_space<vmem>>, vector<1x1x8x128xf32>
    %1 = vector.shape_cast %0 : vector<1x1x8x128xf32> to vector<8x128xf32>
    %c0_3 = arith.constant 0 : index
    %c1 = arith.constant 1 : index
    %c0_4 = arith.constant 0 : index
    %c0_5 = arith.constant 0 : index
    %2 = vector.load %arg2[%c0_3, %c1, %c0_4, %c0_5] : memref<1x3x8x128xf32, #tpu.memory_space<vmem>>, vector<1x1x8x128xf32>
    %3 = vector.shape_cast %2 : vector<1x1x8x128xf32> to vector<8x128xf32>
    %c0_6 = arith.constant 0 : index
    %c2 = arith.constant 2 : index
    %c0_7 = arith.constant 0 : index
    %c0_8 = arith.constant 0 : index
    %4 = vector.load %arg2[%c0_6, %c2, %c0_7, %c0_8] : memref<1x3x8x128xf32, #tpu.memory_space<vmem>>, vector<1x1x8x128xf32>
    %5 = vector.shape_cast %4 : vector<1x1x8x128xf32> to vector<8x128xf32>
    %cst = arith.constant 0.000000e+00 : f32
    %6 = vector.broadcast %cst : f32 to vector<8x128xf32>
    %7 = arith.subf %1, %6 : vector<8x128xf32>
    %cst_9 = arith.constant 5.000000e-01 : f32
    %8 = vector.broadcast %cst_9 : f32 to vector<8x128xf32>
    %9 = arith.divf %7, %8 : vector<8x128xf32>
    %10 = math.floor %9 : vector<8x128xf32>
    %cst_10 = arith.constant -4.000000e+00 : f32
    %11 = vector.broadcast %cst_10 : f32 to vector<8x128xf32>
    %12 = arith.subf %3, %11 : vector<8x128xf32>
    %cst_11 = arith.constant 5.000000e-01 : f32
    %13 = vector.broadcast %cst_11 : f32 to vector<8x128xf32>
    %14 = arith.divf %12, %13 : vector<8x128xf32>
    %15 = math.floor %14 : vector<8x128xf32>
    %cst_12 = arith.constant -2.000000e+00 : f32
    %16 = vector.broadcast %cst_12 : f32 to vector<8x128xf32>
    %17 = arith.subf %5, %16 : vector<8x128xf32>
    %cst_13 = arith.constant 4.000000e+00 : f32
    %18 = vector.broadcast %cst_13 : f32 to vector<8x128xf32>
    %19 = arith.divf %17, %18 : vector<8x128xf32>
    %20 = math.floor %19 : vector<8x128xf32>
    %cst_14 = arith.constant 0.000000e+00 : f32
    %21 = vector.broadcast %cst_14 : f32 to vector<8x128xf32>
    %22 = arith.cmpf oge, %10, %21 : vector<8x128xf32>
    %cst_15 = arith.constant 1.600000e+01 : f32
    %23 = vector.broadcast %cst_15 : f32 to vector<8x128xf32>
    %24 = arith.cmpf olt, %10, %23 : vector<8x128xf32>
    %25 = arith.andi %22, %24 : vector<8x128xi1>
    %cst_16 = arith.constant 0.000000e+00 : f32
    %26 = vector.broadcast %cst_16 : f32 to vector<8x128xf32>
    %27 = arith.cmpf oge, %15, %26 : vector<8x128xf32>
    %28 = arith.andi %25, %27 : vector<8x128xi1>
    %cst_17 = arith.constant 1.600000e+01 : f32
    %29 = vector.broadcast %cst_17 : f32 to vector<8x128xf32>
    %30 = arith.cmpf olt, %15, %29 : vector<8x128xf32>
    %31 = arith.andi %28, %30 : vector<8x128xi1>
    %cst_18 = arith.constant 0.000000e+00 : f32
    %32 = vector.broadcast %cst_18 : f32 to vector<8x128xf32>
    %33 = arith.cmpf oge, %20, %32 : vector<8x128xf32>
    %34 = arith.andi %31, %33 : vector<8x128xi1>
    %cst_19 = arith.constant 1.000000e+00 : f32
    %35 = vector.broadcast %cst_19 : f32 to vector<8x128xf32>
    %36 = arith.cmpf olt, %20, %35 : vector<8x128xf32>
    %37 = arith.andi %34, %36 : vector<8x128xi1>
    %cst_20 = arith.constant -1.000000e+00 : f32
    %cst_21 = arith.constant 1.600000e+01 : f32
    %38 = vector.broadcast %cst_20 : f32 to vector<8x128xf32>
    %39 = arith.maximumf %38, %10 : vector<8x128xf32>
    %40 = vector.broadcast %cst_21 : f32 to vector<8x128xf32>
    %41 = arith.minimumf %40, %39 : vector<8x128xf32>
    %42 = arith.fptosi %41 : vector<8x128xf32> to vector<8x128xi32>
    %cst_22 = arith.constant -1.000000e+00 : f32
    %cst_23 = arith.constant 1.600000e+01 : f32
    %43 = vector.broadcast %cst_22 : f32 to vector<8x128xf32>
    %44 = arith.maximumf %43, %15 : vector<8x128xf32>
    %45 = vector.broadcast %cst_23 : f32 to vector<8x128xf32>
    %46 = arith.minimumf %45, %44 : vector<8x128xf32>
    %47 = arith.fptosi %46 : vector<8x128xf32> to vector<8x128xi32>
    %cst_24 = arith.constant -1.000000e+00 : f32
    %cst_25 = arith.constant 1.000000e+00 : f32
    %48 = vector.broadcast %cst_24 : f32 to vector<8x128xf32>
    %49 = arith.maximumf %48, %20 : vector<8x128xf32>
    %50 = vector.broadcast %cst_25 : f32 to vector<8x128xf32>
    %51 = arith.minimumf %50, %49 : vector<8x128xf32>
    %52 = arith.fptosi %51 : vector<8x128xf32> to vector<8x128xi32>
    %c256_i32 = arith.constant 256 : i32
    %53 = vector.broadcast %c256_i32 : i32 to vector<8x128xi32>
    %54 = arith.muli %52, %53 : vector<8x128xi32>
    %c16_i32 = arith.constant 16 : i32
    %55 = vector.broadcast %c16_i32 : i32 to vector<8x128xi32>
    %56 = arith.muli %47, %55 : vector<8x128xi32>
    %57 = arith.addi %54, %56 : vector<8x128xi32>
    %58 = arith.addi %57, %42 : vector<8x128xi32>
    %c256_i32_26 = arith.constant 256 : i32
    %59 = vector.broadcast %c256_i32_26 : i32 to vector<8x128xi32>
    %60 = arith.select %37, %58, %59 : vector<8x128xi1>, vector<8x128xi32>
    %c0_27 = arith.constant 0 : index
    %c0_28 = arith.constant 0 : index
    %c0_29 = arith.constant 0 : index
    %61 = vector.load %arg3[%c0_27, %c0_28, %c0_29] : memref<1x8x128xi32, #tpu.memory_space<vmem>>, vector<1x8x128xi32>
    %62 = vector.shape_cast %61 : vector<1x8x128xi32> to vector<8x128xi32>
    %63 = vector.shape_cast %60 : vector<8x128xi32> to vector<1x8x128xi32>
    tpu.vector_store %arg3[%c0_27, %c0_28, %c0_29], %63 {strides = array<i32>} : memref<1x8x128xi32, #tpu.memory_space<vmem>>, vector<1x8x128xi32>,
    return
  }
  func.func @transform_0(%arg0: i32, %arg1: i32) -> (i32, i32, i32, i32) {
    %c0_i32 = arith.constant 0 : i32
    %c0_i32_0 = arith.constant 0 : i32
    %c0_i32_1 = arith.constant 0 : i32
    return %arg0, %c0_i32, %arg1, %c0_i32_0 : i32, i32, i32, i32
  }
  func.func @transform_1(%arg0: i32, %arg1: i32) -> (i32, i32, i32) {
    %c0_i32 = arith.constant 0 : i32
    %c0_i32_0 = arith.constant 0 : i32
    return %arg0, %arg1, %c0_i32 : i32, i32, i32
  }
}

</mosaic_0001>

<bundles_post_ra>
// kernel: _batched_hard_voxelize.1
= control target key start
LH: loop header
LB: loop body
LE: loop exit
PB: predicated region body
PF: predicated region fallthrough
CT: control target
= control target key end

     0   :  { %s343_s6 = smov 0   ;;  %s345_s7 = smov 0   ;;  %s380_s0 = inlined_call_operand.vmem [shape: f32[2,3,8,128], index: 0, kind: input, shape index: {}]   ;;  %s381_s1 = inlined_call_operand.vmem [shape: s32[2,8,128], index: 1, kind: output, shape index: {}]  }
   0x1   :  { %s347_s8 = smov 0  }
   0x2 LB: > { %s23_s9 = sadd.s32 1, %s327_s7  ;;  %p268_p0 = scmp.ge.s32.totalorder %s331_s8, 1  ;;  %s331_s8 = sphi %s347_s8, %s11_s8   ;;  %s327_s7 = sphi %s345_s7, %s383_s7   ;;  %s323_s6 = sphi %s343_s6, %s382_s6  }
   0x3   : > { %p25_p1 = scmp.ge.s32.totalorder %s23_s9, 2  ;;  %p106_p2 = scmp.lt.s32.totalorder %s331_s8, 3 }
   0x5   : > { %s385_s9 = smov (%p25_p1, %s23_s9), 0  ;;  %p107_p3 = pnand %p268_p0, %p106_p2 }
   0x6   : > { %p131_p4 = scmp.lt.s32.totalorder (!%p107_p3), %s323_s6, 1 }
   0x7   : > { %110 = sbr.rel (%p107_p3) target bundleno = 39 (0x27), region = 24 }
   0xc   : > { %s387_s6 = smov (!%p131_p4, %s323_s6), 1 }
   0xd   : > { %s278_s10 = smul.u32 24, %s387_s6  ;;  %s270_s14 = sshll.u32 %s387_s6, 3 }
   0xe   : > { %s145_s17 = scalar_lea.vmem %s381_s1, %s270_s14 }
   0xf   : > { %s138_s13 = scalar_lea.vmem %s380_s0, %s278_s10 }
  0x10   : > { %v146_v0 = vld [vmem:[%s138_s13] sm:$0xff]  ;;  %v271_v1 = vld [vmem:[%s138_s13 + $0x8] sm:$0xff]  ;;  %v272_v2 = vld [vmem:[%s138_s13 + $0x10] sm:$0xff] }
  0x11   : > { %v152_v3 = vmul.f32 2.0, %v146_v0  ;;  %v273_v4 = vadd.f32 4.0, %v271_v1  ;;  %v274_v5 = vadd.f32 2.0, %v272_v2 }
  0x13   : > { %v153_v6 = vfloor.f32 %v152_v3  ;;  %v155_v7 = vmul.f32 2.0, %v273_v4  ;;  %v159_v8 = vmul.f32 0.25, %v274_v5 }
  0x15   : > { %v156_v9 = vfloor.f32 %v155_v7  ;;  %v160_v10 = vfloor.f32 %v159_v8  ;;  %vm161_vm0 = vcmp.ge.f32.partialorder %v153_v6, 0.0  ;;  %vm162_vm1 = vcmp.lt.f32.partialorder %v153_v6, 16.0 }
  0x16   : > { %v172_v11 = vmax.f32 %v153_v6, -1.0  ;;  %vm163_vm2 = vmand %vm161_vm0, %vm162_vm1 }
  0x17   : > { %vm164_vm3 = vcmp.ge.f32.partialorder %v156_v9, 0.0  ;;  %v175_v13 = vmax.f32 %v156_v9, -1.0  ;;  %v275_v14 = vclamps-f32 %v160_v10, 1.0  ;;  %vm166_vm5 = vcmp.lt.f32.partialorder %v156_v9, 16.0 }
  0x18   : > { %v173_v12 = vmin.f32 %v172_v11, 16.0  ;;  %vm165_vm4 = vmand %vm163_vm2, %vm164_vm3  ;;  %vm168_vm7 = vcmp.ge.f32.partialorder %v160_v10, 0.0  ;;  %vm170_vm9 = vcmp.lt.f32.partialorder %v160_v10, 1.0 }
  0x19   : > { %v176_v15 = vmin.f32 %v175_v13, 16.0  ;;  %v283_v16 = vtrunc.f32 %v275_v14  ;;  %vm167_vm6 = vmand %vm165_vm4, %vm166_vm5 }
  0x1a   : > { %v279_v17 = vtrunc.f32 %v173_v12  ;;  %vm169_vm8 = vmand %vm167_vm6, %vm168_vm7 }
  0x1b   : > { %v281_v18 = vtrunc.f32 %v176_v15  ;;  %v284_v19 = vcvt.f32.s32 %v283_v16  ;;  %vm171_vm10 = vmand %vm169_vm8, %vm170_vm9 }
  0x1c   : > { %v280_v22 = vcvt.f32.s32 %v279_v17 }
  0x1d   : > { %v282_v20 = vcvt.f32.s32 %v281_v18  ;;  %v181_v21 = vmul.u32 256, %v284_v19 }
  0x1f   : > { %v182_v23 = vmul.u32 16, %v282_v20 }
  0x21   : > { %v183_v24 = vadd.s32 %v182_v23, %v181_v21 }
  0x23   : > { %v184_v25 = vadd.s32 %v280_v22, %v183_v24 }
  0x25   : > { %v185_v26 = vsel %vm171_vm10, %v184_v25, 256 }
  0x26   : > { %186 = vst [vmem:[%s145_s17] sm:$0xff] %v185_v26 }
  0x27 PF: > { %s11_s8 = sadd.s32 1, %s331_s8   ;;  %s382_s6 = smov %s327_s7 }
  0x28   : > { %p8_p5 = scmp.ge.s32.totalorder %s11_s8, 4   ;;  %s383_s7 = smov %s385_s9 }
  0x2a   :  { %10 = sbr.rel (!%p8_p5) target bundleno = 2 (0x2), region = 56 }

</bundles_post_ra>
